<compile_context>
chip_gen: v6e
topology: v6e:2x2x1
jax: 0.10.0
libtpu: 0.0.40
codegen_flags: <defaults>
</compile_context>

<pallas_src>
import jax
import jax.numpy as jnp
from jax.experimental import pallas as pl
from jax.experimental.pallas import tpu as pltpu


def _mlp_kernel(x_ref,
                w1_ref, b1_ref, w2_ref, b2_ref,
                wh1_ref, bh1_ref, wout_ref, bout_ref,
                out_ref):
    x = x_ref[...]                                               # (1, tm)

    # trunk layer 1: rank-1 product -> VPU broadcast multiply-add (no MXU)
    h1 = jnp.maximum(w1_ref[...] * x + b1_ref[...], 0.0)        # (h, tm)

    # trunk layer 2 (MXU)
    h2 = jnp.dot(w2_ref[...], h1,
                 preferred_element_type=jnp.float32) + b2_ref[...]
    h2 = jnp.maximum(h2, 0.0)                                    # (h, tm)

    # fused sin/cos head layer 1: [Ws1; Wc1] @ h2 (MXU)
    a = jnp.dot(wh1_ref[...], h2,
                preferred_element_type=jnp.float32) + bh1_ref[...]
    a = jnp.maximum(a, 0.0)                                      # (2h, tm)

    # fused final layer: exact block-diagonal (2, 2h) weight, (2, 1) bias
    out = jnp.dot(wout_ref[...], a,
                  preferred_element_type=jnp.float32) + bout_ref[...]
    out_ref[...] = out.astype(out_ref.dtype)                     # (2, tm)


def net_forward(x, params, *, tm=None):
    """x: (N, 1) float32; params in PyTorch layout (W: (out,in), b: (out,)).
    Returns (sin, cos), each (N, 1)."""
    N = x.shape[0]
    if tm is None:
        tm = N                       # single grid step for small batches
    assert N % tm == 0, "batch must be divisible by the tile size"
    assert tm == N or tm % 128 == 0, "lane tile must be 128-aligned (or full batch)"
    h = params["w1"].shape[0]

    # ---- pack / fuse parameters (tiny XLA ops, done once per call) ----
    w1 = params["w1"].reshape(h, 1)                      # (h, 1)
    b1 = params["b1"].reshape(h, 1)                      # (h, 1)
    w2 = params["w2"]                                    # (h, h)
    b2 = params["b2"].reshape(h, 1)                      # (h, 1)
    wh1 = jnp.concatenate([params["ws1"], params["wc1"]], axis=0)      # (2h, h)
    bh1 = jnp.concatenate([params["bs1"], params["bc1"]]).reshape(2 * h, 1)
    # exact block-diagonal final weight: row 0 -> sin, row 1 -> cos
    zeros_h = jnp.zeros((1, h), jnp.float32)
    wout = jnp.concatenate([
        jnp.concatenate([params["ws2"], zeros_h], axis=1),             # (1, 2h)
        jnp.concatenate([zeros_h, params["wc2"]], axis=1),             # (1, 2h)
    ], axis=0)                                                         # (2, 2h)
    bout = jnp.concatenate([params["bs2"], params["bc2"]]).reshape(2, 1)

    # batch on the lane axis
    x_t = x.reshape(1, N)                                # (1, N)

    def full_spec(shape):
        # Whole array, constant block index -> fetched once, VMEM-resident.
        n = len(shape)
        return pl.BlockSpec(shape, lambda i, _n=n: (0,) * _n)

    in_specs = [
        pl.BlockSpec((1, tm), lambda i: (0, i)),         # x (lane-dense)
        full_spec((h, 1)),        # w1
        full_spec((h, 1)),        # b1
        full_spec((h, h)),        # w2
        full_spec((h, 1)),        # b2
        full_spec((2 * h, h)),    # fused head weight
        full_spec((2 * h, 1)),    # fused head bias
        full_spec((2, 2 * h)),    # block-diag output weight
        full_spec((2, 1)),        # fused output bias
    ]
    out_specs = pl.BlockSpec((2, tm), lambda i: (0, i))  # lane-dense (2, N)

    out = pl.pallas_call(
        _mlp_kernel,
        out_shape=jax.ShapeDtypeStruct((2, N), jnp.float32),
        grid_spec=pltpu.PrefetchScalarGridSpec(
            num_scalar_prefetch=0,
            grid=(N // tm,),
            in_specs=in_specs,
            out_specs=out_specs,
        ),
        compiler_params=pltpu.CompilerParams(
            dimension_semantics=("parallel",)),
    )(x_t, w1, b1, w2, b2, wh1, bh1, wout, bout)

    sin_out = out[0].reshape(N, 1)
    cos_out = out[1].reshape(N, 1)
    return sin_out, cos_out


def init_params(key, h):
    """PyTorch-style uniform(-1/sqrt(fan_in), 1/sqrt(fan_in)) init.
    Weights stored as (out_features, in_features); biases as (out_features,)."""
    keys = jax.random.split(key, 12)

    def lin(kw, kb, fan_in, fan_out):
        bound = 1.0 / jnp.sqrt(jnp.float32(fan_in))
        w = jax.random.uniform(kw, (fan_out, fan_in), jnp.float32, -bound, bound)
        b = jax.random.uniform(kb, (fan_out,), jnp.float32, -bound, bound)
        return w, b

    w1, b1 = lin(keys[0], keys[1], 1, h)
    w2, b2 = lin(keys[2], keys[3], h, h)
    ws1, bs1 = lin(keys[4], keys[5], h, h)
    ws2, bs2 = lin(keys[6], keys[7], h, 1)
    wc1, bc1 = lin(keys[8], keys[9], h, h)
    wc2, bc2 = lin(keys[10], keys[11], h, 1)
    return dict(w1=w1, b1=b1, w2=w2, b2=b2,
                ws1=ws1, bs1=bs1, ws2=ws2, bs2=bs2,
                wc1=wc1, bc1=bc1, wc2=wc2, bc2=bc2)


def net_forward_ref(x, p):
    relu = lambda a: jnp.maximum(a, 0.0)
    h1 = relu(x @ p["w1"].T + p["b1"])
    h2 = relu(h1 @ p["w2"].T + p["b2"])
    sin = relu(h2 @ p["ws1"].T + p["bs1"]) @ p["ws2"].T + p["bs2"]
    cos = relu(h2 @ p["wc1"].T + p["bc1"]) @ p["wc2"].T + p["bc2"]
    return sin, cos


if __name__ == "__main__":
    key = jax.random.PRNGKey(0)
    k_param, k_x = jax.random.split(key)

    H = 32           # hidden width h
    N = 128          # batch size (single lane-dense grid step: tm = N)

    params = init_params(k_param, H)
    x = jax.random.uniform(k_x, (N, 1), jnp.float32, -jnp.pi, jnp.pi)

    sin_out, cos_out = net_forward(x, params)
    jax.block_until_ready((sin_out, cos_out))

    sin_ref, cos_ref = net_forward_ref(x, params)
    assert jnp.allclose(sin_out, sin_ref, atol=1e-5, rtol=1e-5)
    assert jnp.allclose(cos_out, cos_ref, atol=1e-5, rtol=1e-5)

    print("KERNEL_OK")
</pallas_src>

<mosaic_0001>
module attributes {stable_mosaic.version = 11 : i64} {
  func.func @_mlp_kernel(%arg0: i32, %arg1: memref<1x128xf32, #tpu.memory_space<vmem>>, %arg2: memref<32x1xf32, #tpu.memory_space<vmem>>, %arg3: memref<32x1xf32, #tpu.memory_space<vmem>>, %arg4: memref<32x32xf32, #tpu.memory_space<vmem>>, %arg5: memref<32x1xf32, #tpu.memory_space<vmem>>, %arg6: memref<64x32xf32, #tpu.memory_space<vmem>>, %arg7: memref<64x1xf32, #tpu.memory_space<vmem>>, %arg8: memref<2x64xf32, #tpu.memory_space<vmem>>, %arg9: memref<2x1xf32, #tpu.memory_space<vmem>>, %arg10: memref<2x128xf32, #tpu.memory_space<vmem>>) attributes {dimension_semantics = [#tpu.dimension_semantics<parallel>], iteration_bounds = array<i64: 1>, scalar_prefetch = 0 : i64, scratch_operands = 0 : i64, tpu.core_type = #tpu.core_type<tc>, window_params = [{transform_indices = @transform_0, window_bounds = array<i64: 1, 128>}, {pipeline_mode = #tpu.pipeline_mode<synchronous>, transform_indices = @transform_1, window_bounds = array<i64: 32, 1>}, {pipeline_mode = #tpu.pipeline_mode<synchronous>, transform_indices = @transform_2, window_bounds = array<i64: 32, 1>}, {pipeline_mode = #tpu.pipeline_mode<synchronous>, transform_indices = @transform_3, window_bounds = array<i64: 32, 32>}, {pipeline_mode = #tpu.pipeline_mode<synchronous>, transform_indices = @transform_4, window_bounds = array<i64: 32, 1>}, {pipeline_mode = #tpu.pipeline_mode<synchronous>, transform_indices = @transform_5, window_bounds = array<i64: 64, 32>}, {pipeline_mode = #tpu.pipeline_mode<synchronous>, transform_indices = @transform_6, window_bounds = array<i64: 64, 1>}, {pipeline_mode = #tpu.pipeline_mode<synchronous>, transform_indices = @transform_7, window_bounds = array<i64: 2, 64>}, {pipeline_mode = #tpu.pipeline_mode<synchronous>, transform_indices = @transform_8, window_bounds = array<i64: 2, 1>}, {transform_indices = @transform_9, window_bounds = array<i64: 2, 128>}]} {
    %c0 = arith.constant 0 : index
    %c0_0 = arith.constant 0 : index
    %0 = vector.load %arg1[%c0, %c0_0] : memref<1x128xf32, #tpu.memory_space<vmem>>, vector<1x128xf32>
    %c0_1 = arith.constant 0 : index
    %c0_2 = arith.constant 0 : index
    %1 = vector.load %arg2[%c0_1, %c0_2] : memref<32x1xf32, #tpu.memory_space<vmem>>, vector<32x1xf32>
    %2 = vector.broadcast %1 : vector<32x1xf32> to vector<32x128xf32>
    %3 = vector.broadcast %0 : vector<1x128xf32> to vector<32x128xf32>
    %4 = arith.mulf %2, %3 : vector<32x128xf32>
    %c0_3 = arith.constant 0 : index
    %c0_4 = arith.constant 0 : index
    %5 = vector.load %arg3[%c0_3, %c0_4] : memref<32x1xf32, #tpu.memory_space<vmem>>, vector<32x1xf32>
    %6 = vector.broadcast %5 : vector<32x1xf32> to vector<32x128xf32>
    %7 = arith.addf %4, %6 : vector<32x128xf32>
    %cst = arith.constant 0.000000e+00 : f32
    %8 = vector.broadcast %cst : f32 to vector<32x128xf32>
    %9 = arith.maximumf %7, %8 : vector<32x128xf32>
    %c0_5 = arith.constant 0 : index
    %c0_6 = arith.constant 0 : index
    %10 = vector.load %arg4[%c0_5, %c0_6] : memref<32x32xf32, #tpu.memory_space<vmem>>, vector<32x32xf32>
    %cst_7 = arith.constant dense<0.000000e+00> : vector<32x128xf32>
    %11 = tpu.matmul %10, %9, %cst_7 {dimension_numbers = #tpu.dot_dimension_numbers<[1], [0], [0], [1], [0, 0, 1, 1], [], []>} : vector<32x32xf32>, vector<32x128xf32>, vector<32x128xf32> -> vector<32x128xf32>
    %c0_8 = arith.constant 0 : index
    %c0_9 = arith.constant 0 : index
    %12 = vector.load %arg5[%c0_8, %c0_9] : memref<32x1xf32, #tpu.memory_space<vmem>>, vector<32x1xf32>
    %13 = vector.broadcast %12 : vector<32x1xf32> to vector<32x128xf32>
    %14 = arith.addf %11, %13 : vector<32x128xf32>
    %cst_10 = arith.constant 0.000000e+00 : f32
    %15 = vector.broadcast %cst_10 : f32 to vector<32x128xf32>
    %16 = arith.maximumf %14, %15 : vector<32x128xf32>
    %c0_11 = arith.constant 0 : index
    %c0_12 = arith.constant 0 : index
    %17 = vector.load %arg6[%c0_11, %c0_12] : memref<64x32xf32, #tpu.memory_space<vmem>>, vector<64x32xf32>
    %cst_13 = arith.constant dense<0.000000e+00> : vector<64x128xf32>
    %18 = tpu.matmul %17, %16, %cst_13 {dimension_numbers = #tpu.dot_dimension_numbers<[1], [0], [0], [1], [0, 0, 1, 1], [], []>} : vector<64x32xf32>, vector<32x128xf32>, vector<64x128xf32> -> vector<64x128xf32>
    %c0_14 = arith.constant 0 : index
    %c0_15 = arith.constant 0 : index
    %19 = vector.load %arg7[%c0_14, %c0_15] : memref<64x1xf32, #tpu.memory_space<vmem>>, vector<64x1xf32>
    %20 = vector.broadcast %19 : vector<64x1xf32> to vector<64x128xf32>
    %21 = arith.addf %18, %20 : vector<64x128xf32>
    %cst_16 = arith.constant 0.000000e+00 : f32
    %22 = vector.broadcast %cst_16 : f32 to vector<64x128xf32>
    %23 = arith.maximumf %21, %22 : vector<64x128xf32>
    %c0_17 = arith.constant 0 : index
    %c0_18 = arith.constant 0 : index
    %24 = vector.load %arg8[%c0_17, %c0_18] : memref<2x64xf32, #tpu.memory_space<vmem>>, vector<2x64xf32>
    %cst_19 = arith.constant dense<0.000000e+00> : vector<2x128xf32>
    %25 = tpu.matmul %24, %23, %cst_19 {dimension_numbers = #tpu.dot_dimension_numbers<[1], [0], [0], [1], [0, 0, 1, 1], [], []>} : vector<2x64xf32>, vector<64x128xf32>, vector<2x128xf32> -> vector<2x128xf32>
    %c0_20 = arith.constant 0 : index
    %c0_21 = arith.constant 0 : index
    %26 = vector.load %arg9[%c0_20, %c0_21] : memref<2x1xf32, #tpu.memory_space<vmem>>, vector<2x1xf32>
    %27 = vector.broadcast %26 : vector<2x1xf32> to vector<2x128xf32>
    %28 = arith.addf %25, %27 : vector<2x128xf32>
    %c0_22 = arith.constant 0 : index
    %c0_23 = arith.constant 0 : index
    %29 = vector.load %arg10[%c0_22, %c0_23] : memref<2x128xf32, #tpu.memory_space<vmem>>, vector<2x128xf32>
    tpu.vector_store %arg10[%c0_22, %c0_23], %28 {strides = array<i32>} : memref<2x128xf32, #tpu.memory_space<vmem>>, vector<2x128xf32>,
    return
  }
  func.func @transform_0(%arg0: i32) -> (i32, i32) {
    %c0_i32 = arith.constant 0 : i32
    %c0_i32_0 = arith.constant 0 : i32
    return %c0_i32, %arg0 : i32, i32
  }
  func.func @transform_1(%arg0: i32) -> (i32, i32) {
    %c0_i32 = arith.constant 0 : i32
    %c0_i32_0 = arith.constant 0 : i32
    %c0_i32_1 = arith.constant 0 : i32
    return %c0_i32, %c0_i32_0 : i32, i32
  }
  func.func @transform_2(%arg0: i32) -> (i32, i32) {
    %c0_i32 = arith.constant 0 : i32
    %c0_i32_0 = arith.constant 0 : i32
    %c0_i32_1 = arith.constant 0 : i32
    return %c0_i32, %c0_i32_0 : i32, i32
  }
  func.func @transform_3(%arg0: i32) -> (i32, i32) {
    %c0_i32 = arith.constant 0 : i32
    %c0_i32_0 = arith.constant 0 : i32
    %c0_i32_1 = arith.constant 0 : i32
    return %c0_i32, %c0_i32_0 : i32, i32
  }
  func.func @transform_4(%arg0: i32) -> (i32, i32) {
    %c0_i32 = arith.constant 0 : i32
    %c0_i32_0 = arith.constant 0 : i32
    %c0_i32_1 = arith.constant 0 : i32
    return %c0_i32, %c0_i32_0 : i32, i32
  }
  func.func @transform_5(%arg0: i32) -> (i32, i32) {
    %c0_i32 = arith.constant 0 : i32
    %c0_i32_0 = arith.constant 0 : i32
    %c0_i32_1 = arith.constant 0 : i32
    return %c0_i32, %c0_i32_0 : i32, i32
  }
  func.func @transform_6(%arg0: i32) -> (i32, i32) {
    %c0_i32 = arith.constant 0 : i32
    %c0_i32_0 = arith.constant 0 : i32
    %c0_i32_1 = arith.constant 0 : i32
    return %c0_i32, %c0_i32_0 : i32, i32
  }
  func.func @transform_7(%arg0: i32) -> (i32, i32) {
    %c0_i32 = arith.constant 0 : i32
    %c0_i32_0 = arith.constant 0 : i32
    %c0_i32_1 = arith.constant 0 : i32
    return %c0_i32, %c0_i32_0 : i32, i32
  }
  func.func @transform_8(%arg0: i32) -> (i32, i32) {
    %c0_i32 = arith.constant 0 : i32
    %c0_i32_0 = arith.constant 0 : i32
    %c0_i32_1 = arith.constant 0 : i32
    return %c0_i32, %c0_i32_0 : i32, i32
  }
  func.func @transform_9(%arg0: i32) -> (i32, i32) {
    %c0_i32 = arith.constant 0 : i32
    %c0_i32_0 = arith.constant 0 : i32
    return %c0_i32, %arg0 : i32, i32
  }
}

</mosaic_0001>

<bundles_post_ra>
// kernel: tpu_custom_call.1
= control target key start
LH: loop header
LB: loop body
LE: loop exit
PB: predicated region body
PF: predicated region fallthrough
CT: control target
= control target key end

     0   :  { %v643_v2 = vmov 0   ;;  %s817_s0 = inlined_call_operand.vmem [shape: f32[1,128], index: 0, kind: input, shape index: {}]   ;;  %s818_s1 = inlined_call_operand.vmem [shape: f32[32,1], index: 1, kind: input, shape index: {}]   ;;  %s819_s2 = inlined_call_operand.vmem [shape: f32[32,1], index: 2, kind: input, shape index: {}]   ;;  %s820_s3 = inlined_call_operand.vmem [shape: f32[32,32], index: 3, kind: input, shape index: {}]   ;;  %s821_s4 = inlined_call_operand.vmem [shape: f32[32,1], index: 4, kind: input, shape index: {}]   ;;  %s822_s5 = inlined_call_operand.vmem [shape: f32[64,32], index: 5, kind: input, shape index: {}]   ;;  %s823_s6 = inlined_call_operand.vmem [shape: f32[64,1], index: 6, kind: input, shape index: {}]   ;;  %s824_s7 = inlined_call_operand.vmem [shape: f32[2,64], index: 7, kind: input, shape index: {}]   ;;  %s825_s8 = inlined_call_operand.vmem [shape: f32[2,1], index: 8, kind: input, shape index: {}]   ;;  %s826_s9 = inlined_call_operand.hbm [shape: f32[2,128], index: 9, kind: output, shape index: {}]  }
   0x1   :  { %v71_v0 = vld [vmem:[%s819_s2 + $0x18] sm:$0xff]  ;;  %620 = vset.pattern.permute.xlu1 %v643_v2  ;;  %619 = vset.pattern.permute.xlu0 %v643_v2  ;;  %v36_v3 = vld [vmem:[%s818_s1 + $0x10] sm:$0xff]  ;;  %v35_v4 = vld [vmem:[%s818_s1 + $0x8] sm:$0xff] }
   0x2   :  { %v37_v1 = vld [vmem:[%s818_s1 + $0x18] sm:$0xff]  ;;  %89 = vperm.xlu1 %620, %v71_v0   ;;  %v70_v5 = vld [vmem:[%s819_s2 + $0x10] sm:$0xff]  ;;  %v34_v6 = vld [vmem:[%s818_s1] sm:$0xff] }
   0x3   :  { %55 = vperm.xlu0 %619, %v37_v1  }
   0x6   :  { %45 = vperm.xlu1 %620, %v35_v4  }
   0x7   :  { %50 = vperm.xlu0 %619, %v36_v3  }
   0x8   :  { %14 = vsyncpa [#allocation3], 0  ;;  %v69_v7 = vld [vmem:[%s819_s2 + $0x8] sm:$0xff]  ;;  %v68_v8 = vld [vmem:[%s819_s2] sm:$0xff]  ;;  %vm128_vm0 = vcmask 261120   ;;  %vm645_vm1 = vmmov 0  }
   0x9   :  { %v107_v9 = vld [vmem:[%s821_s4 + $0x18] sm:$0xff]  ;;  %v106_v10 = vld [vmem:[%s821_s4 + $0x10] sm:$0xff]  ;;  %v100_v11 = vld [vmem:[%s820_s3] sm:$0xff]  ;;  %vm430_vm2 = vcmask 523264   ;;  %s646_s26 = smov [#allocation2]  }
   0xa   :  { %40 = vperm.xlu1 %620, %v34_v6   ;;  %570 = vmatprep.mubr.msk.f32.mxu0 %vm128_vm0, %v100_v11  ;;  %v105_v12 = vld [vmem:[%s821_s4 + $0x8] sm:$0xff]  ;;  %v104_v13 = vld [vmem:[%s821_s4] sm:$0xff]  ;;  %v245_v14 = vld [vmem:[%s823_s6 + $0x38] sm:$0xff]  ;;  %s511_s27 = sshll.u32 %s646_s26, 4  ;;  %s512_s27 = int_to_ptr.vmem [resolvable:$true] %s511_s27 }
   0xb   :  { %84 = vperm.xlu0 %619, %v70_v5   ;;  %v244_v15 = vld [vmem:[%s823_s6 + $0x30] sm:$0xff]  ;;  %v243_v16 = vld [vmem:[%s823_s6 + $0x28] sm:$0xff]  ;;  %v242_v17 = vld [vmem:[%s823_s6 + $0x20] sm:$0xff]  ;;  %s621_s28 = scalar_lea.vmem %s512_s27, 32  ;;  %p626_p1 = scmp.lt.s32.totalorder %s512_s27, %s512_s27 }
   0xc   :  { %v241_v18 = vld [vmem:[%s823_s6 + $0x18] sm:$0xff]  ;;  %v240_v19 = vld [vmem:[%s823_s6 + $0x10] sm:$0xff]  ;;  %v239_v20 = vld [vmem:[%s823_s6 + $0x8] sm:$0xff]  ;;  %p622_p0 = scmp.ne.s32.totalorder %s512_s27, %s621_s28  ;;  %p627_p2 = scmp.lt.s32.totalorder %s621_s28, %s621_s28 }
   0xd   :  { %v238_v21 = vld [vmem:[%s823_s6] sm:$0xff]  ;;  %v101_v44 = vld [vmem:[%s820_s3 + $0x8] sm:$0xff]  ;;  %v102_v45 = vld [vmem:[%s820_s3 + $0x10] sm:$0xff] }
   0xe   :  { %74 = vperm.xlu1 %620, %v68_v8   ;;  %v424_v22 = vld [vmem:[%s825_s8] sm:$0x3]  ;;  %v103_v46 = vld [vmem:[%s820_s3 + $0x18] sm:$0xff]  ;;  %v231_v0 = vld [vmem:[%s822_s5 + $0x8] sm:$0xff]  ;;  %p628_p3 = por %p627_p2, %p626_p1 }
   0xf   :  { %79 = vperm.xlu0 %619, %v69_v7   ;;  %v519_v23 = vld [vmem:[%s817_s0] ss:$0 sm:$0xff]  ;;  %v232_v1 = vld [vmem:[%s822_s5 + $0x10] sm:$0xff]  ;;  %v233_v2 = vld [vmem:[%s822_s5 + $0x18] sm:$0xff]  ;;  %v644_v7 = vmov 0.0  }
  0x10   :  { %v230_v47 = vld [vmem:[%s822_s5] sm:$0xff]  ;;  %v235_v4 = vld [vmem:[%s822_s5 + $0x28] sm:$0xff]  ;;  %v236_v5 = vld [vmem:[%s822_s5 + $0x30] sm:$0xff]  ;;  %p629_p4 = pnand %p628_p3, %p622_p0 }
  0x11   :  { %584 = vmatprep.mubr.msk.f32.mxu1 %vm128_vm0, %v230_v47  ;;  %v234_v3 = vld [vmem:[%s822_s5 + $0x20] sm:$0xff]  ;;  %v237_v6 = vld [vmem:[%s822_s5 + $0x38] sm:$0xff] }
  0x12   :  { %120 = vperm.xlu1 %620, %v106_v10  }
  0x13   :  { %125 = vperm.xlu0 %619, %v107_v9  }
  0x16   :  { %110 = vperm.xlu1 %620, %v104_v13  }
  0x17   :  { %115 = vperm.xlu0 %619, %v105_v12  }
  0x1a   :  { %278 = vperm.xlu1 %620, %v244_v15  }
  0x1b   :  { %283 = vperm.xlu0 %619, %v245_v14  }
  0x1e   :  { %268 = vperm.xlu1 %620, %v242_v17  }
  0x1f   :  { %273 = vperm.xlu0 %619, %v243_v16  }
  0x22   :  { %258 = vperm.xlu1 %620, %v240_v19  }
  0x23   :  { %263 = vperm.xlu0 %619, %v241_v18  }
  0x26   :  { %248 = vperm.xlu1 %620, %v238_v21  }
  0x27   :  { %253 = vperm.xlu0 %619, %v239_v20  }
  0x2b   :  { %427 = vperm.xlu0 %619, %v424_v22  }
  0x7d   :  { %v90_v24 = vpop.permute.xlu1 %89 }
  0x7e   :  { %v56_v25 = vpop.permute.xlu0 %55 }
  0x7f   :  { %v67_v26 = vmul.f32 %v519_v23, %v56_v25 }
  0x81   :  { %v95_v27 = vadd.f32 %v90_v24, %v67_v26  ;;  %v46_v29 = vpop.permute.xlu1 %45 }
  0x82   :  { %v51_v28 = vpop.permute.xlu0 %50  ;;  %v65_v35 = vmul.f32 %v519_v23, %v46_v29 }
  0x83   :  { %v99_v30 = vmax.f32 %v95_v27, 0.0  ;;  %v66_v31 = vmul.f32 %v519_v23, %v51_v28 }
  0x85   :  { %562 = vmatprep.subr.mxu0 %v99_v30  ;;  %v41_v33 = vpop.permute.xlu1 %40 }
  0x86   :  { %v85_v32 = vpop.permute.xlu0 %84  ;;  %563 = vmatpush3.msra.mxu0 %v99_v30  ;;  %v64_v37 = vmul.f32 %v519_v23, %v41_v33 }
  0x87   :  { %v94_v34 = vadd.f32 %v85_v32, %v66_v31 }
  0x89   :  { %v98_v36 = vmax.f32 %v94_v34, 0.0  ;;  %v75_v39 = vpop.permute.xlu1 %74 }
  0x8a   :  { %v80_v38 = vpop.permute.xlu0 %79  ;;  %v92_v41 = vadd.f32 %v75_v39, %v64_v37 }
  0x8b   :  { %v93_v40 = vadd.f32 %v80_v38, %v65_v35  ;;  %564 = vmatprep.subr.mxu0 %v98_v36 }
  0x8c   :  { %565 = vmatpush3.msra.mxu0 %v98_v36  ;;  %v96_v43 = vmax.f32 %v92_v41, 0.0 }
  0x8d   :  { %v97_v42 = vmax.f32 %v93_v40, 0.0  ;;  %v121_v50 = vpop.permute.xlu1 %120  ;;  %v423_v40 = vld [vmem:[%s824_s7] sm:$0x3] }
  0x8e   :  { %v126_v48 = vpop.permute.xlu0 %125 }
  0x8f   :  { %566 = vmatprep.subr.mxu0 %v97_v42 }
  0x90   :  { %567 = vmatpush3.msra.mxu0 %v97_v42 }
  0x91   :  { %568 = vmatprep.subr.mxu0 %v96_v43  ;;  %v111_v59 = vpop.permute.xlu1 %110 }
  0x92   :  { %569 = vmatpush3.msra.mxu0 %v96_v43  ;;  %v116_v54 = vpop.permute.xlu0 %115 }
  0x93   :  { %571 = vmatmul.mubr.msk.f32.vlgmr.msra.gmra.mxu0 %vm128_vm0, %v101_v44  ;;  %596 = vmatprep.subr.mxu0 %v644_v7 }
  0x94   :  { %573 = vmatprep.mubr.msk.f32.mxu0 %vm128_vm0, %v102_v45 }
  0x95   :  { %v279_v12 = vpop.permute.xlu1 %278 }
  0x96   :  { %v284_v10 = vpop.permute.xlu0 %283 }
  0x97   :  { %574 = vmatmul.mubr.msk.f32.gmra.mxu0 %vm128_vm0, %v103_v46 }
  0x98   :  { %612 = vmatprep.mubr.msk.f32.mxu0 %vm645_vm1, %v644_v7 }
  0x99   :  { %v269_v17 = vpop.permute.xlu1 %268 }
  0x9a   :  { %v274_v15 = vpop.permute.xlu0 %273 }
  0x9d   :  { %v259_v27 = vpop.permute.xlu1 %258 }
  0x9e   :  { %v264_v24 = vpop.permute.xlu0 %263 }
  0xa1   :  { %v249_v35 = vpop.permute.xlu1 %248 }
  0xa2   :  { %v254_v32 = vpop.permute.xlu0 %253 }
  0xa6   :  { %v428_v41 = vpop.permute.xlu0 %427 }
 0x153   :  { %v572_v49 = vpop.f32.mrf.mxu0 }
 0x154   :  { %v213_v56 = vadd.f32 %v572_v49, %v116_v54 }
 0x155   :  { %v207_v51 = vpop.f32.mrf.mxu0 }
 0x156   :  { %v208_v60 = vadd.f32 %v207_v51, %v111_v59  ;;  %v227_v62 = vmax.f32 %v213_v56, 0.0 }
 0x157   :  { %v575_v52 = vpop.f32.mrf.mxu0 }
 0x158   :  { %v223_v53 = vadd.f32 %v575_v52, %v126_v48  ;;  %v226_v63 = vmax.f32 %v208_v60, 0.0 }
 0x159   :  { %v217_v55 = vpop.f32.mrf.mxu0 }
 0x15a   :  { %v229_v57 = vmax.f32 %v223_v53, 0.0  ;;  %v218_v58 = vadd.f32 %v217_v55, %v121_v50 }
 0x15c   :  { %v228_v61 = vmax.f32 %v218_v58, 0.0  ;;  %576 = vmatprep.subr.mxu1 %v229_v57 }
 0x15d   :  { %577 = vmatpush3.msra.mxu1 %v229_v57 }
 0x15e   :  { %578 = vmatprep.subr.mxu1 %v228_v61 }
 0x15f   :  { %579 = vmatpush3.msra.mxu1 %v228_v61 }
 0x160   :  { %580 = vmatprep.subr.mxu1 %v227_v62 }
 0x161   :  { %581 = vmatpush3.msra.mxu1 %v227_v62 }
 0x162   :  { %582 = vmatprep.subr.mxu1 %v226_v63 }
 0x163   :  { %583 = vmatpush3.msra.mxu1 %v226_v63 }
 0x164   :  { %585 = vmatmul.mubr.msk.f32.vlgmr.msra.gmra.mxu1 %vm128_vm0, %v231_v0 }
 0x165   :  { %587 = vmatprep.mubr.msk.f32.mxu1 %vm128_vm0, %v232_v1 }
 0x168   :  { %588 = vmatmul.mubr.msk.f32.gmra.mxu1 %vm128_vm0, %v233_v2 }
 0x169   :  { %590 = vmatprep.mubr.msk.f32.mxu1 %vm128_vm0, %v234_v3 }
 0x16c   :  { %591 = vmatmul.mubr.msk.f32.gmra.mxu1 %vm128_vm0, %v235_v4 }
 0x16d   :  { %593 = vmatprep.mubr.msk.f32.mxu1 %vm128_vm0, %v236_v5 }
 0x170   :  { %594 = vmatmul.mubr.msk.f32.gmra.mxu1 %vm128_vm0, %v237_v6 }
 0x224   :  { %v586_v8 = vpop.f32.mrf.mxu1 }
 0x225   :  { %v382_v33 = vadd.f32 %v586_v8, %v254_v32 }
 0x226   :  { %v376_v9 = vpop.f32.mrf.mxu1 }
 0x227   :  { %v377_v36 = vadd.f32 %v376_v9, %v249_v35  ;;  %v416_v38 = vmax.f32 %v382_v33, 0.0 }
 0x228   :  { %v589_v11 = vpop.f32.mrf.mxu1 }
 0x229   :  { %v392_v28 = vadd.f32 %v589_v11, %v264_v24  ;;  %v415_v39 = vmax.f32 %v377_v36, 0.0 }
 0x22a   :  { %v386_v13 = vpop.f32.mrf.mxu1 }
 0x22b   :  { %v387_v30 = vadd.f32 %v386_v13, %v259_v27  ;;  %v418_v34 = vmax.f32 %v392_v28, 0.0 }
 0x22c   :  { %v592_v14 = vpop.f32.mrf.mxu1 }
 0x22d   :  { %v402_v21 = vadd.f32 %v592_v14, %v274_v15  ;;  %v417_v37 = vmax.f32 %v387_v30, 0.0 }
 0x22e   :  { %v396_v16 = vpop.f32.mrf.mxu1 }
 0x22f   :  { %v397_v25 = vadd.f32 %v396_v16, %v269_v17  ;;  %v420_v29 = vmax.f32 %v402_v21, 0.0 }
 0x230   :  { %v595_v18 = vpop.f32.mrf.mxu1 }
 0x231   :  { %v412_v19 = vadd.f32 %v595_v18, %v284_v10  ;;  %v419_v31 = vmax.f32 %v397_v25, 0.0 }
 0x232   :  { %v406_v20 = vpop.f32.mrf.mxu1 }
 0x233   :  { %v422_v22 = vmax.f32 %v412_v19, 0.0  ;;  %v407_v23 = vadd.f32 %v406_v20, %v279_v12 }
 0x235   :  { %v421_v26 = vmax.f32 %v407_v23, 0.0  ;;  %597 = vmatpush3.msra.mxu0 %v422_v22 }
 0x236   :  { %598 = vmatprep.subr.mxu0 %v644_v7 }
 0x237   :  { %599 = vmatpush3.msra.mxu0 %v421_v26 }
 0x238   :  { %600 = vmatprep.subr.mxu0 %v644_v7 }
 0x239   :  { %601 = vmatpush3.msra.mxu0 %v420_v29 }
 0x23a   :  { %602 = vmatprep.subr.mxu0 %v644_v7 }
 0x23b   :  { %603 = vmatpush3.msra.mxu0 %v419_v31 }
 0x23c   :  { %604 = vmatprep.subr.mxu0 %v644_v7 }
 0x23d   :  { %605 = vmatpush3.msra.mxu0 %v418_v34 }
 0x23e   :  { %606 = vmatprep.subr.mxu0 %v644_v7 }
 0x23f   :  { %607 = vmatpush3.msra.mxu0 %v417_v37 }
 0x240   :  { %608 = vmatprep.subr.mxu0 %v644_v7 }
 0x241   :  { %609 = vmatpush3.msra.mxu0 %v416_v38 }
 0x242   :  { %610 = vmatprep.subr.mxu0 %v644_v7 }
 0x243   :  { %611 = vmatpush3.msra.mxu0 %v415_v39 }
 0x244   :  { %613 = vmatmul.mubr.msk.f32.vlgmr.msra.gmra.mxu0 %vm430_vm2, %v423_v40 }
 0x304   :  { %v500_v42 = vpop.f32.mrf.mxu0 }
 0x305   :  { %v501_v43 = vadd.f32 %v500_v42, %v428_v41 }
 0x306   :  { %v614_v44 = vpop.f32.mrf.mxu0 }
 0x307   :  { %504 = vst [vmem:[#allocation2] sm:$0x3] %v501_v43 }
 0x308   :  { %632 = shalt.err (!%p629_p4)
}
 0x309   :  { %514 = dma.vmem_to_hbm [thread:$0]  %s512_s27, 32, %s826_s9, [#allocation3]  }
 0x30a   :  { %641 = dma.done.wait [#allocation3], 32  }
 0x30b   :  { %642 = vsyncadd [#allocation3], 4294967264 }
 0x30c   :  { %518 = vsyncpa [#allocation3], 1 }

</bundles_post_ra>
